<compile_context>
chip_gen: v5e
topology: v5e:2x2
jax: 0.10.0
libtpu: 0.0.40
codegen_flags: <defaults>
</compile_context>

<pallas_src>
import math

import jax
import jax.numpy as jnp
from jax.experimental import pallas as pl
from jax.experimental.pallas import tpu as pltpu

NUM_HEADS = 4


def _classification_head_kernel(
    x_ref,       # (Bt, C, HW)  channel-major spatial tokens (NCHW with H*W flattened)
    pos0_ref,    # (1, C)       positional embedding of the mean/query token
    possp_ref,   # (C, HW)      positional embedding of spatial tokens (channel-major)
    wq_ref, bq_ref,    # (C, C)  in x out, pre-scaled by 1/sqrt(hd);  (1, C)
    wk_ref, bk_ref,    # (C, C)  out x in (PyTorch layout, used as w @ x_chw);  (C, 1)
    wv_ref, bv_ref,    # (C, C)  out x in;  (C, 1)
    wc_ref, bc_ref,    # (C, 2C) in x out;  (1, 2C)
    wfc_ref, bfc_ref,  # (2C, NC) in x out; (1, NC)
    out_ref,           # (1, Bt, NC)
):
    f32 = jnp.float32
    x = x_ref[...].astype(f32)                           # (Bt, C, HW)
    Bt, C, HW = x.shape
    NH = NUM_HEADS
    hd = C // NH
    mm = wq_ref.dtype                                    # matmul input precision (f32 or bf16)

    # ---- token construction (channel-major; no activation transpose anywhere) ----
    mean_tok = jnp.mean(x, axis=2) + pos0_ref[...]       # (Bt, C)   query token (= mean + pos[0])
    x_tok = x + possp_ref[...][None]                     # (Bt, C, HW) spatial tokens + pos emb
    # Mean token appended as the last key/value column (token order does not
    # change the pooled result).
    tok = jnp.concatenate([x_tok, mean_tok[:, :, None]], axis=2)     # (Bt, C, T)
    T = tok.shape[2]

    # ---- projections --------------------------------------------------------
    # q: one batched (Bt, C) x (C, C) matmul; 1/sqrt(hd) already folded into wq/bq.
    q = jnp.dot(mean_tok.astype(mm), wq_ref[...],
                preferred_element_type=f32) + bq_ref[...]            # (Bt, C)

    # k/v: one (C, C) x (C, T) matmul per batch element over ALL T tokens,
    # producing channel-major K^T / V^T directly from the channel-major input.
    tok_mm = tok.astype(mm)
    k_list, v_list = [], []
    for b in range(Bt):                                  # Bt is a small, static block size
        tb = tok_mm[b]                                                # (C, T)
        k_list.append(jnp.dot(wk_ref[...], tb, preferred_element_type=f32))
        v_list.append(jnp.dot(wv_ref[...], tb, preferred_element_type=f32))
    kT = jnp.stack(k_list, axis=0) + bk_ref[...][None]                # (Bt, C, T)
    vT = jnp.stack(v_list, axis=0) + bv_ref[...][None]                # (Bt, C, T)

    # ---- heads-on-sublane attention: single softmax over all T tokens --------
    qk = q[:, :, None] * kT                                           # (Bt, C, T)
    s = qk.reshape(Bt * NH, hd, T).sum(axis=1)                        # (Bt*NH, T) per-head scores
    m = jnp.max(s, axis=-1, keepdims=True)
    p = jnp.exp(s - m)
    p = p * pl.reciprocal(jnp.sum(p, axis=-1, keepdims=True), approx=True)
    p_full = jnp.broadcast_to(p[:, None, :], (Bt * NH, hd, T)).reshape(Bt, C, T)
    attn = jnp.sum(p_full * vT, axis=2)                               # (Bt, C) pooled heads

    # ---- c_proj -> (dropout == identity at inference) -> fc -> sigmoid -------
    pooled = jnp.dot(attn.astype(mm), wc_ref[...],
                     preferred_element_type=f32) + bc_ref[...]        # (Bt, 2C)
    logits = jnp.dot(pooled.astype(mm), wfc_ref[...],
                     preferred_element_type=f32) + bfc_ref[...]       # (Bt, NC)
    out_ref[0] = jax.nn.sigmoid(logits)                  # one lane-dense (Bt, NC) store per step


def init_params(key, feature_num, in_channels, num_classes):
    """Deterministic parameter init (PyTorch-style shapes: Linear weight is (out, in))."""
    C = in_channels
    T = feature_num + 1
    ks = jax.random.split(key, 11)

    def lin(kw, kb, fan_in, fan_out):
        bound = 1.0 / math.sqrt(fan_in)
        w = jax.random.uniform(kw, (fan_out, fan_in), jnp.float32, -bound, bound)
        b = jax.random.uniform(kb, (fan_out,), jnp.float32, -bound, bound)
        return w, b

    pos = jax.random.normal(ks[0], (T, C), jnp.float32) / math.sqrt(C)
    wq, bq = lin(ks[1], ks[2], C, C)
    wk, bk = lin(ks[3], ks[4], C, C)
    wv, bv = lin(ks[5], ks[6], C, C)
    wc, bc = lin(ks[7], ks[8], C, 2 * C)
    wfc, bfc = lin(ks[9], ks[10], 2 * C, num_classes)
    return dict(pos=pos, wq=wq, bq=bq, wk=wk, bk=bk, wv=wv, bv=bv,
                wc=wc, bc=bc, wfc=wfc, bfc=bfc)


def classification_head(x_nchw, params, *, block_b=None, matmul_dtype=jnp.float32):
    """ClassificationHead forward (eval mode): AttentionPool -> Dropout(id) -> fc -> sigmoid."""
    N, C, H, W = x_nchw.shape
    HW = H * W
    NC = int(params["wfc"].shape[0])
    NH = NUM_HEADS
    hd = C // NH
    assert C % NH == 0 and hd % 8 == 0, "in_channels must be a multiple of 32"

    if block_b is None:
        # Amortize the ~0.35us per-grid-step overhead over several batch elements,
        # but keep >= 2 grid tiles when N >= 2 so both v7x TensorCores get work.
        block_b = max(1, min(8, (N + 1) // 2))
    n_tiles = (N + block_b - 1) // block_b
    n_pad = n_tiles * block_b

    # Free reshape only -- no NCHW -> NHWC transpose in HBM.
    x = x_nchw.reshape(N, C, HW).astype(jnp.float32)
    if n_pad != N:
        x = jnp.pad(x, ((0, n_pad - N), (0, 0), (0, 0)))

    f32 = jnp.float32
    mm = matmul_dtype
    scale = 1.0 / math.sqrt(hd)
    pos = params["pos"].astype(f32)
    pos0 = pos[0:1]                                          # (1, C)
    possp = jnp.transpose(pos[1:])                           # (C, HW) channel-major
    wq_t = (params["wq"].astype(f32).T * scale).astype(mm)   # (C, C) in x out, scale folded in
    bq_s = (params["bq"].astype(f32) * scale).reshape(1, C)
    wk = params["wk"].astype(mm)                             # (C, C) out x in
    bk = params["bk"].astype(f32).reshape(C, 1)
    wv = params["wv"].astype(mm)
    bv = params["bv"].astype(f32).reshape(C, 1)
    wc_t = params["wc"].astype(f32).T.astype(mm)             # (C, 2C) in x out
    bc = params["bc"].astype(f32).reshape(1, 2 * C)
    wfc_t = params["wfc"].astype(f32).T.astype(mm)           # (2C, NC) in x out
    bfc = params["bfc"].astype(f32).reshape(1, NC)

    whole = lambda i: (0, 0)
    in_specs = [
        pl.BlockSpec((block_b, C, HW), lambda i: (i, 0, 0)),               # x (batch tile)
        pl.BlockSpec((1, C), whole),                                       # pos[0]
        pl.BlockSpec((C, HW), whole),                                      # pos[1:] channel-major
        pl.BlockSpec((C, C), whole), pl.BlockSpec((1, C), whole),          # q proj
        pl.BlockSpec((C, C), whole), pl.BlockSpec((C, 1), whole),          # k proj
        pl.BlockSpec((C, C), whole), pl.BlockSpec((C, 1), whole),          # v proj
        pl.BlockSpec((C, 2 * C), whole), pl.BlockSpec((1, 2 * C), whole),  # c_proj
        pl.BlockSpec((2 * C, NC), whole), pl.BlockSpec((1, NC), whole),    # fc
    ]
    out_specs = pl.BlockSpec((1, block_b, NC), lambda i: (i, 0, 0))

    out = pl.pallas_call(
        _classification_head_kernel,
        out_shape=jax.ShapeDtypeStruct((n_tiles, block_b, NC), jnp.float32),
        grid_spec=pltpu.PrefetchScalarGridSpec(
            num_scalar_prefetch=0,
            grid=(n_tiles,),
            in_specs=in_specs,
            out_specs=out_specs,
        ),
        compiler_params=pltpu.CompilerParams(
            dimension_semantics=("parallel",),
            vmem_limit_bytes=64 * 1024 * 1024,
        ),
    )(x, pos0, possp, wq_t, bq_s, wk, bk, wv, bv, wc_t, bc, wfc_t, bfc)
    return out.reshape(n_pad, NC)[:N]


def classification_head_reference(x_nchw, params):
    """Pure-JAX reference matching the PyTorch forward (eval mode)."""
    N, C, H, W = x_nchw.shape
    HW = H * W
    hd = C // NUM_HEADS
    x = jnp.transpose(x_nchw.reshape(N, C, HW), (0, 2, 1))            # (N, HW, C)
    tokens = jnp.concatenate([x.mean(axis=1, keepdims=True), x], 1)   # (N, HW+1, C)
    tokens = tokens + params["pos"][None]                             # + pos emb
    q_in = tokens[:, :1]                                              # query = mean token

    def lin(t, w, b):
        return t @ w.T + b

    q = lin(q_in, params["wq"], params["bq"]) / math.sqrt(hd)         # (N, 1, C)
    k = lin(tokens, params["wk"], params["bk"])                       # (N, T, C)
    v = lin(tokens, params["wv"], params["bv"])                       # (N, T, C)
    qh = q.reshape(N, 1, NUM_HEADS, hd).transpose(0, 2, 1, 3)
    kh = k.reshape(N, -1, NUM_HEADS, hd).transpose(0, 2, 1, 3)
    vh = v.reshape(N, -1, NUM_HEADS, hd).transpose(0, 2, 1, 3)
    s = jnp.einsum("bhqd,bhkd->bhqk", qh, kh)
    p = jax.nn.softmax(s, axis=-1)
    o = jnp.einsum("bhqk,bhkd->bhqd", p, vh)                          # (N, H, 1, hd)
    o = o.transpose(0, 2, 1, 3).reshape(N, C)
    pooled = o @ params["wc"].T + params["bc"]                        # (N, 2C)
    logits = pooled @ params["wfc"].T + params["bfc"]                 # (N, NC)
    return jax.nn.sigmoid(logits)


if __name__ == "__main__":
    # small shapes consistent with the module: feature_shape=(8, 8), in_channels=32
    batch = 4
    in_channels = 32
    H = W = 8
    num_classes = 3

    key = jax.random.PRNGKey(0)
    k_x, k_p = jax.random.split(key)
    x = jax.random.normal(k_x, (batch, in_channels, H, W), jnp.float32)
    params = init_params(k_p, H * W, in_channels, num_classes)

    ref = classification_head_reference(x, params)

    # f32 path (tolerance accounts for the EUP approximate-reciprocal softmax).
    out = jax.block_until_ready(classification_head(x, params))
    assert out.shape == (batch, num_classes)
    assert jnp.allclose(out, ref, atol=1e-2, rtol=1e-2), (out, ref)

    # bf16 MXU path (f32 accumulation, f32 element-wise math) for v6e/v7x.
    out_bf16 = jax.block_until_ready(
        classification_head(x, params, matmul_dtype=jnp.bfloat16))
    assert out_bf16.shape == (batch, num_classes)
    assert jnp.allclose(out_bf16, ref, atol=5e-2, rtol=5e-2), (out_bf16, ref)

    print("KERNEL_OK")
</pallas_src>

<mosaic_0001>
module attributes {stable_mosaic.version = 11 : i64} {
  func.func @_classification_head_kernel(%arg0: i32, %arg1: memref<2x32x64xf32, #tpu.memory_space<vmem>>, %arg2: memref<1x32xf32, #tpu.memory_space<vmem>>, %arg3: memref<32x64xf32, #tpu.memory_space<vmem>>, %arg4: memref<32x32xf32, #tpu.memory_space<vmem>>, %arg5: memref<1x32xf32, #tpu.memory_space<vmem>>, %arg6: memref<32x32xf32, #tpu.memory_space<vmem>>, %arg7: memref<32x1xf32, #tpu.memory_space<vmem>>, %arg8: memref<32x32xf32, #tpu.memory_space<vmem>>, %arg9: memref<32x1xf32, #tpu.memory_space<vmem>>, %arg10: memref<32x64xf32, #tpu.memory_space<vmem>>, %arg11: memref<1x64xf32, #tpu.memory_space<vmem>>, %arg12: memref<64x3xf32, #tpu.memory_space<vmem>>, %arg13: memref<1x3xf32, #tpu.memory_space<vmem>>, %arg14: memref<1x2x3xf32, #tpu.memory_space<vmem>>) attributes {dimension_semantics = [#tpu.dimension_semantics<parallel>], iteration_bounds = array<i64: 2>, scalar_prefetch = 0 : i64, scratch_operands = 0 : i64, tpu.core_type = #tpu.core_type<tc>, window_params = [{transform_indices = @transform_0, window_bounds = array<i64: 2, 32, 64>}, {pipeline_mode = #tpu.pipeline_mode<synchronous>, transform_indices = @transform_1, window_bounds = array<i64: 1, 32>}, {pipeline_mode = #tpu.pipeline_mode<synchronous>, transform_indices = @transform_2, window_bounds = array<i64: 32, 64>}, {pipeline_mode = #tpu.pipeline_mode<synchronous>, transform_indices = @transform_3, window_bounds = array<i64: 32, 32>}, {pipeline_mode = #tpu.pipeline_mode<synchronous>, transform_indices = @transform_4, window_bounds = array<i64: 1, 32>}, {pipeline_mode = #tpu.pipeline_mode<synchronous>, transform_indices = @transform_5, window_bounds = array<i64: 32, 32>}, {pipeline_mode = #tpu.pipeline_mode<synchronous>, transform_indices = @transform_6, window_bounds = array<i64: 32, 1>}, {pipeline_mode = #tpu.pipeline_mode<synchronous>, transform_indices = @transform_7, window_bounds = array<i64: 32, 32>}, {pipeline_mode = #tpu.pipeline_mode<synchronous>, transform_indices = @transform_8, window_bounds = array<i64: 32, 1>}, {pipeline_mode = #tpu.pipeline_mode<synchronous>, transform_indices = @transform_9, window_bounds = array<i64: 32, 64>}, {pipeline_mode = #tpu.pipeline_mode<synchronous>, transform_indices = @transform_10, window_bounds = array<i64: 1, 64>}, {pipeline_mode = #tpu.pipeline_mode<synchronous>, transform_indices = @transform_11, window_bounds = array<i64: 64, 3>}, {pipeline_mode = #tpu.pipeline_mode<synchronous>, transform_indices = @transform_12, window_bounds = array<i64: 1, 3>}, {transform_indices = @transform_13, window_bounds = array<i64: 1, 2, 3>}]} {
    %c0 = arith.constant 0 : index
    %c0_0 = arith.constant 0 : index
    %c0_1 = arith.constant 0 : index
    %0 = vector.load %arg1[%c0, %c0_0, %c0_1] : memref<2x32x64xf32, #tpu.memory_space<vmem>>, vector<2x32x64xf32>
    %cst = arith.constant dense<0.000000e+00> : vector<2x32xf32>
    %1 = vector.multi_reduction <add>, %0, %cst [2] : vector<2x32x64xf32> to vector<2x32xf32>
    %cst_2 = arith.constant 6.400000e+01 : f32
    %2 = vector.broadcast %cst_2 : f32 to vector<2x32xf32>
    %3 = arith.divf %1, %2 : vector<2x32xf32>
    %c0_3 = arith.constant 0 : index
    %c0_4 = arith.constant 0 : index
    %4 = vector.load %arg2[%c0_3, %c0_4] : memref<1x32xf32, #tpu.memory_space<vmem>>, vector<1x32xf32>
    %5 = vector.broadcast %4 : vector<1x32xf32> to vector<2x32xf32>
    %6 = arith.addf %3, %5 : vector<2x32xf32>
    %c0_5 = arith.constant 0 : index
    %c0_6 = arith.constant 0 : index
    %7 = vector.load %arg3[%c0_5, %c0_6] : memref<32x64xf32, #tpu.memory_space<vmem>>, vector<32x64xf32>
    %8 = vector.shape_cast %7 : vector<32x64xf32> to vector<1x32x64xf32>
    %9 = vector.broadcast %8 : vector<1x32x64xf32> to vector<2x32x64xf32>
    %10 = arith.addf %0, %9 : vector<2x32x64xf32>
    %11 = vector.shape_cast %6 : vector<2x32xf32> to vector<2x32x1xf32>
    %12 = tpu.concatenate %10, %11 in 2 : vector<2x32x64xf32>, vector<2x32x1xf32> -> vector<2x32x65xf32>
    %c0_7 = arith.constant 0 : index
    %c0_8 = arith.constant 0 : index
    %13 = vector.load %arg4[%c0_7, %c0_8] : memref<32x32xf32, #tpu.memory_space<vmem>>, vector<32x32xf32>
    %cst_9 = arith.constant dense<0.000000e+00> : vector<2x32xf32>
    %14 = tpu.matmul %6, %13, %cst_9 {dimension_numbers = #tpu.dot_dimension_numbers<[1], [0], [0], [1], [0, 0, 1, 1], [], []>} : vector<2x32xf32>, vector<32x32xf32>, vector<2x32xf32> -> vector<2x32xf32>
    %c0_10 = arith.constant 0 : index
    %c0_11 = arith.constant 0 : index
    %15 = vector.load %arg5[%c0_10, %c0_11] : memref<1x32xf32, #tpu.memory_space<vmem>>, vector<1x32xf32>
    %16 = vector.broadcast %15 : vector<1x32xf32> to vector<2x32xf32>
    %17 = arith.addf %14, %16 : vector<2x32xf32>
    %18 = vector.extract_strided_slice %12 {offsets = [0, 0, 0], sizes = [1, 32, 65], strides = [1, 1, 1]} : vector<2x32x65xf32> to vector<1x32x65xf32>
    %19 = vector.shape_cast %18 : vector<1x32x65xf32> to vector<32x65xf32>
    %c0_12 = arith.constant 0 : index
    %c0_13 = arith.constant 0 : index
    %20 = vector.load %arg6[%c0_12, %c0_13] : memref<32x32xf32, #tpu.memory_space<vmem>>, vector<32x32xf32>
    %cst_14 = arith.constant dense<0.000000e+00> : vector<32x65xf32>
    %21 = tpu.matmul %20, %19, %cst_14 {dimension_numbers = #tpu.dot_dimension_numbers<[1], [0], [0], [1], [0, 0, 1, 1], [], []>} : vector<32x32xf32>, vector<32x65xf32>, vector<32x65xf32> -> vector<32x65xf32>
    %c0_15 = arith.constant 0 : index
    %c0_16 = arith.constant 0 : index
    %22 = vector.load %arg8[%c0_15, %c0_16] : memref<32x32xf32, #tpu.memory_space<vmem>>, vector<32x32xf32>
    %cst_17 = arith.constant dense<0.000000e+00> : vector<32x65xf32>
    %23 = tpu.matmul %22, %19, %cst_17 {dimension_numbers = #tpu.dot_dimension_numbers<[1], [0], [0], [1], [0, 0, 1, 1], [], []>} : vector<32x32xf32>, vector<32x65xf32>, vector<32x65xf32> -> vector<32x65xf32>
    %24 = vector.extract_strided_slice %12 {offsets = [1, 0, 0], sizes = [1, 32, 65], strides = [1, 1, 1]} : vector<2x32x65xf32> to vector<1x32x65xf32>
    %25 = vector.shape_cast %24 : vector<1x32x65xf32> to vector<32x65xf32>
    %c0_18 = arith.constant 0 : index
    %c0_19 = arith.constant 0 : index
    %26 = vector.load %arg6[%c0_18, %c0_19] : memref<32x32xf32, #tpu.memory_space<vmem>>, vector<32x32xf32>
    %cst_20 = arith.constant dense<0.000000e+00> : vector<32x65xf32>
    %27 = tpu.matmul %26, %25, %cst_20 {dimension_numbers = #tpu.dot_dimension_numbers<[1], [0], [0], [1], [0, 0, 1, 1], [], []>} : vector<32x32xf32>, vector<32x65xf32>, vector<32x65xf32> -> vector<32x65xf32>
    %c0_21 = arith.constant 0 : index
    %c0_22 = arith.constant 0 : index
    %28 = vector.load %arg8[%c0_21, %c0_22] : memref<32x32xf32, #tpu.memory_space<vmem>>, vector<32x32xf32>
    %cst_23 = arith.constant dense<0.000000e+00> : vector<32x65xf32>
    %29 = tpu.matmul %28, %25, %cst_23 {dimension_numbers = #tpu.dot_dimension_numbers<[1], [0], [0], [1], [0, 0, 1, 1], [], []>} : vector<32x32xf32>, vector<32x65xf32>, vector<32x65xf32> -> vector<32x65xf32>
    %30 = vector.shape_cast %21 : vector<32x65xf32> to vector<1x32x65xf32>
    %31 = vector.shape_cast %27 : vector<32x65xf32> to vector<1x32x65xf32>
    %32 = tpu.concatenate %30, %31 in 0 : vector<1x32x65xf32>, vector<1x32x65xf32> -> vector<2x32x65xf32>
    %c0_24 = arith.constant 0 : index
    %c0_25 = arith.constant 0 : index
    %33 = vector.load %arg7[%c0_24, %c0_25] : memref<32x1xf32, #tpu.memory_space<vmem>>, vector<32x1xf32>
    %34 = vector.shape_cast %33 : vector<32x1xf32> to vector<1x32x1xf32>
    %35 = vector.broadcast %34 : vector<1x32x1xf32> to vector<2x32x65xf32>
    %36 = arith.addf %32, %35 : vector<2x32x65xf32>
    %37 = vector.shape_cast %23 : vector<32x65xf32> to vector<1x32x65xf32>
    %38 = vector.shape_cast %29 : vector<32x65xf32> to vector<1x32x65xf32>
    %39 = tpu.concatenate %37, %38 in 0 : vector<1x32x65xf32>, vector<1x32x65xf32> -> vector<2x32x65xf32>
    %c0_26 = arith.constant 0 : index
    %c0_27 = arith.constant 0 : index
    %40 = vector.load %arg9[%c0_26, %c0_27] : memref<32x1xf32, #tpu.memory_space<vmem>>, vector<32x1xf32>
    %41 = vector.shape_cast %40 : vector<32x1xf32> to vector<1x32x1xf32>
    %42 = vector.broadcast %41 : vector<1x32x1xf32> to vector<2x32x65xf32>
    %43 = arith.addf %39, %42 : vector<2x32x65xf32>
    %44 = vector.shape_cast %17 : vector<2x32xf32> to vector<2x32x1xf32>
    %45 = vector.broadcast %44 : vector<2x32x1xf32> to vector<2x32x65xf32>
    %46 = arith.mulf %45, %36 : vector<2x32x65xf32>
    %47 = vector.shape_cast %46 : vector<2x32x65xf32> to vector<8x8x65xf32>
    %cst_28 = arith.constant dense<0.000000e+00> : vector<8x65xf32>
    %48 = vector.multi_reduction <add>, %47, %cst_28 [1] : vector<8x8x65xf32> to vector<8x65xf32>
    %cst_29 = arith.constant dense<0xFF800000> : vector<8xf32>
    %49 = vector.multi_reduction <maximumf>, %48, %cst_29 [1] : vector<8x65xf32> to vector<8xf32>
    %50 = vector.shape_cast %49 : vector<8xf32> to vector<8x1xf32>
    %51 = vector.broadcast %50 : vector<8x1xf32> to vector<8x65xf32>
    %52 = arith.subf %48, %51 : vector<8x65xf32>
    %53 = math.exp %52 : vector<8x65xf32>
    %cst_30 = arith.constant dense<0.000000e+00> : vector<8xf32>
    %54 = vector.multi_reduction <add>, %53, %cst_30 [1] : vector<8x65xf32> to vector<8xf32>
    %55 = vector.shape_cast %54 : vector<8xf32> to vector<8x1xf32>
    %56 = tpu.reciprocal %55 {approx = true} : vector<8x1xf32> -> vector<8x1xf32>
    %57 = vector.broadcast %56 : vector<8x1xf32> to vector<8x65xf32>
    %58 = arith.mulf %53, %57 : vector<8x65xf32>
    %59 = vector.shape_cast %58 : vector<8x65xf32> to vector<8x1x65xf32>
    %60 = vector.shape_cast %59 : vector<8x1x65xf32> to vector<8x1x65xf32>
    %61 = vector.broadcast %60 : vector<8x1x65xf32> to vector<8x8x65xf32>
    %62 = vector.shape_cast %61 : vector<8x8x65xf32> to vector<2x32x65xf32>
    %63 = arith.mulf %62, %43 : vector<2x32x65xf32>
    %cst_31 = arith.constant dense<0.000000e+00> : vector<2x32xf32>
    %64 = vector.multi_reduction <add>, %63, %cst_31 [2] : vector<2x32x65xf32> to vector<2x32xf32>
    %c0_32 = arith.constant 0 : index
    %c0_33 = arith.constant 0 : index
    %65 = vector.load %arg10[%c0_32, %c0_33] : memref<32x64xf32, #tpu.memory_space<vmem>>, vector<32x64xf32>
    %cst_34 = arith.constant dense<0.000000e+00> : vector<2x64xf32>
    %66 = tpu.matmul %64, %65, %cst_34 {dimension_numbers = #tpu.dot_dimension_numbers<[1], [0], [0], [1], [0, 0, 1, 1], [], []>} : vector<2x32xf32>, vector<32x64xf32>, vector<2x64xf32> -> vector<2x64xf32>
    %c0_35 = arith.constant 0 : index
    %c0_36 = arith.constant 0 : index
    %67 = vector.load %arg11[%c0_35, %c0_36] : memref<1x64xf32, #tpu.memory_space<vmem>>, vector<1x64xf32>
    %68 = vector.broadcast %67 : vector<1x64xf32> to vector<2x64xf32>
    %69 = arith.addf %66, %68 : vector<2x64xf32>
    %c0_37 = arith.constant 0 : index
    %c0_38 = arith.constant 0 : index
    %70 = vector.load %arg12[%c0_37, %c0_38] : memref<64x3xf32, #tpu.memory_space<vmem>>, vector<64x3xf32>
    %cst_39 = arith.constant dense<0.000000e+00> : vector<2x3xf32>
    %71 = tpu.matmul %69, %70, %cst_39 {dimension_numbers = #tpu.dot_dimension_numbers<[1], [0], [0], [1], [0, 0, 1, 1], [], []>} : vector<2x64xf32>, vector<64x3xf32>, vector<2x3xf32> -> vector<2x3xf32>
    %c0_40 = arith.constant 0 : index
    %c0_41 = arith.constant 0 : index
    %72 = vector.load %arg13[%c0_40, %c0_41] : memref<1x3xf32, #tpu.memory_space<vmem>>, vector<1x3xf32>
    %73 = vector.broadcast %72 : vector<1x3xf32> to vector<2x3xf32>
    %74 = arith.addf %71, %73 : vector<2x3xf32>
    %75 = arith.negf %74 : vector<2x3xf32>
    %76 = math.exp %75 : vector<2x3xf32>
    %cst_42 = arith.constant 1.000000e+00 : f32
    %77 = vector.broadcast %cst_42 : f32 to vector<2x3xf32>
    %78 = arith.addf %77, %76 : vector<2x3xf32>
    %79 = arith.divf %77, %78 : vector<2x3xf32>
    %c0_43 = arith.constant 0 : index
    %c0_44 = arith.constant 0 : index
    %c0_45 = arith.constant 0 : index
    %80 = vector.load %arg14[%c0_43, %c0_44, %c0_45] : memref<1x2x3xf32, #tpu.memory_space<vmem>>, vector<1x2x3xf32>
    %81 = vector.shape_cast %80 : vector<1x2x3xf32> to vector<2x3xf32>
    %82 = vector.shape_cast %79 : vector<2x3xf32> to vector<1x2x3xf32>
    tpu.vector_store %arg14[%c0_43, %c0_44, %c0_45], %82 {strides = array<i32>} : memref<1x2x3xf32, #tpu.memory_space<vmem>>, vector<1x2x3xf32>,
    return
  }
  func.func @transform_0(%arg0: i32) -> (i32, i32, i32) {
    %c0_i32 = arith.constant 0 : i32
    %c0_i32_0 = arith.constant 0 : i32
    %c0_i32_1 = arith.constant 0 : i32
    return %arg0, %c0_i32, %c0_i32_0 : i32, i32, i32
  }
  func.func @transform_1(%arg0: i32) -> (i32, i32) {
    %c0_i32 = arith.constant 0 : i32
    %c0_i32_0 = arith.constant 0 : i32
    %c0_i32_1 = arith.constant 0 : i32
    return %c0_i32, %c0_i32_0 : i32, i32
  }
  func.func @transform_2(%arg0: i32) -> (i32, i32) {
    %c0_i32 = arith.constant 0 : i32
    %c0_i32_0 = arith.constant 0 : i32
    %c0_i32_1 = arith.constant 0 : i32
    return %c0_i32, %c0_i32_0 : i32, i32
  }
  func.func @transform_3(%arg0: i32) -> (i32, i32) {
    %c0_i32 = arith.constant 0 : i32
    %c0_i32_0 = arith.constant 0 : i32
    %c0_i32_1 = arith.constant 0 : i32
    return %c0_i32, %c0_i32_0 : i32, i32
  }
  func.func @transform_4(%arg0: i32) -> (i32, i32) {
    %c0_i32 = arith.constant 0 : i32
    %c0_i32_0 = arith.constant 0 : i32
    %c0_i32_1 = arith.constant 0 : i32
    return %c0_i32, %c0_i32_0 : i32, i32
  }
  func.func @transform_5(%arg0: i32) -> (i32, i32) {
    %c0_i32 = arith.constant 0 : i32
    %c0_i32_0 = arith.constant 0 : i32
    %c0_i32_1 = arith.constant 0 : i32
    return %c0_i32, %c0_i32_0 : i32, i32
  }
  func.func @transform_6(%arg0: i32) -> (i32, i32) {
    %c0_i32 = arith.constant 0 : i32
    %c0_i32_0 = arith.constant 0 : i32
    %c0_i32_1 = arith.constant 0 : i32
    return %c0_i32, %c0_i32_0 : i32, i32
  }
  func.func @transform_7(%arg0: i32) -> (i32, i32) {
    %c0_i32 = arith.constant 0 : i32
    %c0_i32_0 = arith.constant 0 : i32
    %c0_i32_1 = arith.constant 0 : i32
    return %c0_i32, %c0_i32_0 : i32, i32
  }
  func.func @transform_8(%arg0: i32) -> (i32, i32) {
    %c0_i32 = arith.constant 0 : i32
    %c0_i32_0 = arith.constant 0 : i32
    %c0_i32_1 = arith.constant 0 : i32
    return %c0_i32, %c0_i32_0 : i32, i32
  }
  func.func @transform_9(%arg0: i32) -> (i32, i32) {
    %c0_i32 = arith.constant 0 : i32
    %c0_i32_0 = arith.constant 0 : i32
    %c0_i32_1 = arith.constant 0 : i32
    return %c0_i32, %c0_i32_0 : i32, i32
  }
  func.func @transform_10(%arg0: i32) -> (i32, i32) {
    %c0_i32 = arith.constant 0 : i32
    %c0_i32_0 = arith.constant 0 : i32
    %c0_i32_1 = arith.constant 0 : i32
    return %c0_i32, %c0_i32_0 : i32, i32
  }
  func.func @transform_11(%arg0: i32) -> (i32, i32) {
    %c0_i32 = arith.constant 0 : i32
    %c0_i32_0 = arith.constant 0 : i32
    %c0_i32_1 = arith.constant 0 : i32
    return %c0_i32, %c0_i32_0 : i32, i32
  }
  func.func @transform_12(%arg0: i32) -> (i32, i32) {
    %c0_i32 = arith.constant 0 : i32
    %c0_i32_0 = arith.constant 0 : i32
    %c0_i32_1 = arith.constant 0 : i32
    return %c0_i32, %c0_i32_0 : i32, i32
  }
  func.func @transform_13(%arg0: i32) -> (i32, i32, i32) {
    %c0_i32 = arith.constant 0 : i32
    %c0_i32_0 = arith.constant 0 : i32
    %c0_i32_1 = arith.constant 0 : i32
    return %arg0, %c0_i32, %c0_i32_0 : i32, i32, i32
  }
}

</mosaic_0001>

<bundles_post_ra>
// kernel: tpu_custom_call.1
= control target key start
LH: loop header
LB: loop body
LE: loop exit
PB: predicated region body
PF: predicated region fallthrough
CT: control target
= control target key end

     0   :  { %s2210_s0 = inlined_call_operand.hbm [shape: f32[4,32,64], index: 0, kind: input, shape index: {}]   ;;  %s2211_s1 = inlined_call_operand.vmem [shape: f32[1,32], index: 1, kind: input, shape index: {}]   ;;  %s2212_s2 = inlined_call_operand.vmem [shape: f32[32,64], index: 2, kind: input, shape index: {}]   ;;  %s2213_s3 = inlined_call_operand.vmem [shape: f32[32,32], index: 3, kind: input, shape index: {}]   ;;  %s2214_s4 = inlined_call_operand.vmem [shape: f32[1,32], index: 4, kind: input, shape index: {}]   ;;  %s2215_s5 = inlined_call_operand.vmem [shape: f32[32,32], index: 5, kind: input, shape index: {}]   ;;  %s2216_s6 = inlined_call_operand.vmem [shape: f32[32,1], index: 6, kind: input, shape index: {}]   ;;  %s2217_s7 = inlined_call_operand.vmem [shape: f32[32,32], index: 7, kind: input, shape index: {}]   ;;  %s2218_s8 = inlined_call_operand.vmem [shape: f32[32,1], index: 8, kind: input, shape index: {}]   ;;  %s2219_s9 = inlined_call_operand.hbm [shape: f32[32,64], index: 9, kind: input, shape index: {}]   ;;  %s2220_s10 = inlined_call_operand.vmem [shape: f32[1,64], index: 10, kind: input, shape index: {}]   ;;  %s2221_s11 = inlined_call_operand.vmem [shape: f32[64,3], index: 11, kind: input, shape index: {}]   ;;  %s2222_s12 = inlined_call_operand.vmem [shape: f32[1,3], index: 12, kind: input, shape index: {}]   ;;  %s2223_s13 = inlined_call_operand.hbm [shape: f32[2,2,3], index: 13, kind: output, shape index: {}]  }
   0x1   :  { %2230 = sst [smem:[#allocation15_spill]] %s2219_s9 }
   0x2   :  { %2231 = sst [smem:[#allocation16_spill]] %s2222_s12 }
   0x3   :  { %2232 = sst [smem:[#allocation17_spill]] %s2223_s13 }
   0x4   :  { %18 = vsyncpa [#allocation3], 0 }
   0x5   :  { %20 = vsyncpa [#allocation3 + $0x1], 0 }
   0x6   :  { %21 = vsyncpa [#allocation6], 0 }
   0x7   :  { %22 = vsyncpa [#allocation4], 0 }
   0x8   :  { %24 = vsyncpa [#allocation4 + $0x1], 0  ;;  %s1760_s25 = smov 0   ;;  %s1762_s26 = smov 0  }
   0x9   :  { %s1764_s27 = smov 0   ;;  %s1766_s28 = smov 0  }
   0xa LB: > { %2233 = sst [smem:[#allocation11_spill]] %s1670_s25  ;;  %s1781_s29 = sadd.s32 4294967295, %s1682_s28   ;;  %s1682_s28 = sphi %s1766_s28, %s2254_s28   ;;  %s1678_s27 = sphi %s1764_s27, %s2251_s27   ;;  %s1674_s26 = sphi %s1762_s26, %s2253_s26   ;;  %s1670_s25 = sphi %s1760_s25, %s2252_s25  }
   0xb   : > { %2234 = sst [smem:[#allocation12_spill]] %s1678_s27  ;;  %s1386_s30 = sadd.s32 4294967294, %s1682_s28  }
   0xc   : > { %p50_p0 = scmp.ne.s32.totalorder %s1674_s26, %s1670_s25  ;;  %p51_p1 = scmp.eq.s32.totalorder %s1781_s29, 0 }
   0xd   : > { %p326_p2 = scmp.eq.s32.totalorder %s1781_s29, 1  ;;  %p332_p3 = scmp.eq.s32.totalorder %s1386_s30, 1 }
   0xe   : > { %p1790_p4 = por %p51_p1, %p50_p0  ;;  %p1387_p5 = scmp.ge.s32.totalorder %s1682_s28, 1 }
   0xf   : > { %p1795_p6 = por %p332_p3, %p50_p0  ;;  %p339_p7 = scmp.lt.s32.totalorder %s1682_s28, 3 }
  0x10   : > { %s2238_s9 = sld [smem:[#allocation15_spill]]  ;;  %s1684_s20 = smov [#allocation5]  }
  0x11   : > { %s2236_s15 = scalar_select %p1795_p6, 1, 0 }
  0x12   : > { %p1803_p8 = pnand %p1387_p5, %p339_p7  ;;  %s376_s21 = sshll.u32 %s1684_s20, 4  ;;  %s377_s21 = int_to_ptr.vmem [resolvable:$true] %s376_s21 }
  0x13   : > { %2237 = sst [smem:[#allocation13_spill]] %s2236_s15  ;;  %s1813_s22 = sadd.s32 1, %s1682_s28  }
  0x14   : > { %p1432_p9 = pneg %p1803_p8  ;;  %s2227_s23 = smov 128  }
  0x15   : > { %s2228_s24 = smov 8   ;;  %s34_s30 = ssub.s32 %s1682_s28, %s1813_s22 }
  0x16   : > { %s374_s18 = sshll.u32 %s2238_s9, 4  ;;  %p1433_p10 = pnand %p1432_p9, %p51_p1  ;;  %s375_s18 = int_to_ptr.hbm [resolvable:$true] %s374_s18 }
  0x17   : > { %s37_s16 = sadd.s32 1, %s1678_s27  ;;  %p35_p12 = scmp.eq.s32.totalorder %s34_s30, 0 }
  0x18   : > { %1435 = dma.hbm_to_vmem [thread:$0]  (!%p1433_p10), %s375_s18, 512, %s377_s21, [#allocation6], %s2227_s23, %s2227_s23, %s2228_s24  }
  0x19   : > { %p44_p13 = scmp.ne.s32.totalorder %s1678_s27, %s1674_s26  ;;  %p45_p0 = scmp.eq.s32.totalorder %s1682_s28, 0 }
  0x1a   : > { %s1825_s17 = scalar_select %p35_p12, %s1678_s27, %s37_s16  }
  0x1b   : > { %p1829_p3 = por %p326_p2, %p44_p13  ;;  %p1445_p5 = scmp.lt.s32.totalorder %s1682_s28, 2 }
  0x1c   : > { %2240 = sst [smem:[#allocation14_spill]] %s1825_s17  ;;  %s399_s9 = sand.u32 1, %s1678_s27  }
  0x1d   : > { %s1423_s15 = sshll.u32 %s1682_s28, 6  ;;  %p46_p7 = por %p45_p0, %p44_p13 }
  0x1e   : > { %s1390_s25 = sshll.u32 %s399_s9, 6  ;;  %s409_s18 = scalar_lea.hbm %s2210_s0, %s1423_s15 }
  0x1f   : > { %s410_s21 = sshll.u32 %s409_s18, 4  ;;  %s403_s30 = scalar_lea.vmem [#allocation2], %s1390_s25  ;;  %s411_s21 = int_to_ptr.hbm [resolvable:$true] %s410_s21 }
  0x20   : > { %s412_s23 = sshll.u32 %s403_s30, 4  ;;  %p1839_p9 = pnand %p1445_p5, %p46_p7  ;;  %s413_s23 = int_to_ptr.vmem [resolvable:$true] %s412_s23 }
  0x21   : > { %s400_s24 = scalar_lea.sflag [#allocation3], %s399_s9  ;;  %s1582_s17 = sshra.s32 %s411_s21, 4  ;;  %s1583_s17 = int_to_ptr.hbm [resolvable:$true] %s1582_s17 }
  0x22   : > { %s1584_s27 = scalar_lea.hbm %s1583_s17, 64  ;;  %p1586_p10 = pneg %p1839_p9 }
  0x23   : > { %p1585_p2 = scmp.ne.s32.totalorder %s1583_s17, %s1584_s27  ;;  %s1589_s25 = scalar_lea.hbm %s2210_s0, 128 }
  0x24   : > { %p1590_p0 = scmp.lt.s32.totalorder %s1583_s17, %s2210_s0  ;;  %p1591_p5 = scmp.lt.s32.totalorder %s1589_s25, %s1584_s27 }
  0x25   : > { %p1587_p12 = pnand %p1586_p10, %p1585_p2 }
  0x26   : > { %p1592_p7 = por %p1591_p5, %p1590_p0 }
  0x27   : > { %p1588_p13 = pneg %p1587_p12 }
  0x29   : > { %p1593_p11 = pnand %p1592_p7, %p1588_p13 }
  0x2b   : > { %1596 = shalt.err (!%p1593_p11)
}
  0x2c   : > { %s2243_s9 = smov 8   ;;  %s2244_s30 = smov 128  }
  0x2d   : > { %1439 = dma.hbm_to_vmem [thread:$0]  (!%p1839_p9), %s411_s21, 1024, %s413_s23, %s400_s24, %s2244_s30, %s2244_s30, %s2243_s9  }
  0x2e   : > { %424 = sbr.rel (%p1803_p8) target bundleno = 1362 (0x552), region = 72  ;;  %s1859_s12 = sand.u32 (!%p1803_p8), 1, %s1674_s26  }
  0x2f   : > { %s1395_s17 = sshll.u32 (!%p1803_p8), %s1859_s12, 6  ;;  %s427_s27 = scalar_lea.sflag (!%p1803_p8), [#allocation3], %s1859_s12 }
  0x30   : > { %s1863_s13 = scalar_lea.vmem (!%p1803_p8), [#allocation2], %s1395_s17 }
  0x33   : > { %1657 = dma.done.wait (%p1790_p4), %s427_s27, 1024  }
  0x34   : > { %1659 = vsyncadd (%p1790_p4), %s427_s27, 4294966272 }
  0x35   : > { %1661 = dma.done.wait (%p51_p1), [#allocation6], 512  }
  0x36   : > { %1663 = vsyncadd (%p51_p1), [#allocation6], 4294966784  ;;  %v531_v0 = vlaneseq  ;;  %vm488_vm0 = vcmask 523264   ;;  %v1886_v4 = vld [vmem:[%s1863_s13 + $0x20] sm:$0xff]  ;;  %v1889_v5 = vld [vmem:[%s1863_s13 + $0x10] sm:$0xff]  ;;  %v1687_v22 = vmov 64.0  }
  0x37   : > { %v501_v6 = vsel %vm488_vm0, %v1886_v4, 0.0  ;;  %v495_v7 = vsel %vm488_vm0, %v1889_v5, 0.0  ;;  %v1896_v8 = vld [vmem:[%s1863_s13] sm:$0xff]  ;;  %v1901_v10 = vld [vmem:[%s1863_s13 + $0x28] sm:$0xff]  ;;  %v1904_v11 = vld [vmem:[%s1863_s13 + $0x30] sm:$0xff]  ;;  %1528 = vrcp.f32 %v1687_v22  ;;  %v1688_v23 = vmov 0  }
  0x38   : > { %v1874_v1 = vshrl.u32 %v531_v0, 7  ;;  %502 = vadd.xlane.f32.xlu1 %v501_v6  ;;  %496 = vadd.xlane.f32.xlu2 %v495_v7  ;;  %v489_v9 = vsel %vm488_vm0, %v1896_v8, 0.0  ;;  %v1907_v12 = vld [vmem:[%s1863_s13 + $0x8] sm:$0xff]  ;;  %v504_v13 = vsel %vm488_vm0, %v1901_v10, 0.0  ;;  %v507_v14 = vsel %vm488_vm0, %v1904_v11, 0.0  ;;  %v1916_v16 = vld [vmem:[%s1863_s13 + $0x38] sm:$0xff] }
  0x39   : > { %490 = vadd.xlane.f32.xlu0 %v489_v9  ;;  %v492_v15 = vsel %vm488_vm0, %v1907_v12, 0.0  ;;  %v1919_v17 = vld [vmem:[%s1863_s13 + $0x18] sm:$0xff]  ;;  %v510_v18 = vsel %vm488_vm0, %v1916_v16, 0.0  ;;  %v1524_v20 = vld [vmem:[%s2211_s1] ss:$0 sm:$0xff]  ;;  %s1689_s23 = smov 64  }
  0x3a   : > { %1486 = vset.pattern.permute.xlu2 %v1874_v1  ;;  %v1878_v2 = vadd.s32 8, %v1874_v1  ;;  %v1881_v3 = vadd.s32 16, %v1874_v1  ;;  %v498_v19 = vsel %vm488_vm0, %v1919_v17, 0.0  ;;  %v1929_v21 = vadd.s32 24, %v1874_v1  ;;  %v846_v59 = vld [vmem:[%s2216_s6] sm:$0xff]  ;;  %v849_v62 = vld [vmem:[%s2216_s6 + $0x18] sm:$0xff] }
  0x3b   : > { %v847_v63 = vld [vmem:[%s2216_s6 + $0x8] sm:$0xff]  ;;  %v848_v7 = vld [vmem:[%s2216_s6 + $0x10] sm:$0xff]  ;;  %v622_v9 = vld [vmem:[%s2213_s3 + $0x18] sm:$0xff]  ;;  %vm656_vm2 = vcmask 130112   ;;  %vm660_vm3 = vcmask 195712   ;;  %vm664_vm4 = vcmask 261312  }
  0x3c   : > { %1487 = vset.pattern.permute.xlu0 %v1878_v2  ;;  %1488 = vset.pattern.permute.xlu1 %v1881_v3  ;;  %vm673_vm5 = vcmask 1041409   ;;  %vm675_vm6 = vcmask 261120   ;;  %vm968_vm7 = vcmask 531456   ;;  %vm1034_vm8 = vcmask 1042434   ;;  %s2245_s24 = sld [smem:[#allocation16_spill]]  ;;  %s1397_s21 = sshll.u32 %s1859_s12, 1 }
  0x3d   : > { %v1529_v24 = vpop.eup %1528  ;;  %690 = vmatpush.msra.mxu0 %v622_v9  ;;  %vm1036_vm9 = vcmask 1043459   ;;  %vm1038_vm10 = vcmask 1044484   ;;  %vm1040_vm11 = vcmask 1045509   ;;  %vm1042_vm12 = vcmask 1046534   ;;  %s1419_s16 = sshll.u32 %s1781_s29, 1  ;;  %s2246_s18 = sld [smem:[#allocation17_spill]] }
  0x3e   : > { %v514_v25 = vmul.f32 64.0, %v1529_v24  ;;  %vm518_vm1 = vweird.f32 %v1529_v24  ;;  %vm1044_vm13 = vcmask 1047559   ;;  %s478_s30 = scalar_lea.vmem [#allocation7], %s1397_s21  ;;  %s1291_s29 = scalar_lea.sflag [#allocation4], %s1859_s12 }
  0x3f   : > { %s1303_s17 = sshll.u32 %s478_s30, 4  ;;  %s1304_s17 = int_to_ptr.vmem [resolvable:$true] %s1303_s17 }
  0x40   : > { %505 = vadd.xlane.f32.xlu1 %v504_v13  ;;  %508 = vadd.xlane.f32.xlu2 %v507_v14  ;;  %v515_v26 = vsub.f32 1.0, %v514_v25  ;;  %v621_v13 = vld [vmem:[%s2213_s3 + $0x10] sm:$0xff]  ;;  %v620_v14 = vld [vmem:[%s2213_s3 + $0x8] sm:$0xff] }
  0x41   : > { %493 = vadd.xlane.f32.xlu0 %v492_v15  ;;  %691 = vmatpush.msra.mxu0 %v621_v13  ;;  %v619_v15 = vld [vmem:[%s2213_s3] sm:$0xff] }
  0x42   : > { %v516_v28 = vmul.f32 %v1529_v24, %v515_v26 }
  0x43   : > { %692 = vmatpush.msra.mxu0 %v620_v14  ;;  %s1301_s9 = scalar_lea.hbm %s2246_s18, %s1419_s16 }
  0x44   : > { %v517_v29 = vadd.f32 %v1529_v24, %v516_v28  ;;  %s1305_s27 = sshll.u32 %s1301_s9, 4  ;;  %s1306_s27 = int_to_ptr.hbm [resolvable:$true] %s1305_s27 }
  0x45   : > { %693 = vmatpush.msra.mxu0 %v619_v15  ;;  %s1626_s13 = sshra.s32 %s1306_s27, 4  ;;  %s1627_s13 = int_to_ptr.hbm [resolvable:$true] %s1626_s13 }
  0x46   : > { %v519_v32 = vsel %vm518_vm1, %v1529_v24, %v517_v29  ;;  %v1963_v24 = vand.u32 127, %v531_v0  ;;  %vm1288_vm1 = vcmask 17408   ;;  %s1628_s14 = scalar_lea.hbm %s1627_s13, 2  ;;  %p1633_p11 = scmp.lt.s32.totalorder %s1627_s13, %s2246_s18 }
  0x47   : > { %p1629_p1 = scmp.ne.s32.totalorder %s1627_s13, %s1628_s14 }
  0x48   : > { %511 = vadd.xlane.f32.xlu1 %v510_v18  ;;  %v1966_v25 = vadd.s32 4294967288, %v1963_v24  ;;  %v1970_v28 = vadd.s32 4294967280, %v1963_v24 }
  0x49   : > { %499 = vadd.xlane.f32.xlu0 %v498_v19  ;;  %p1630_p4 = pnand %p1629_p1, %p1829_p3 }
  0x4b   : > { %p1631_p8 = pneg %p1630_p4 }
  0x58   : > { %535 = vperm.xlu2 %1486, %v1524_v20  }
  0x5d   : > { %541 = vperm.xlu0 %1487, %v1524_v20  }
  0x60   : > { %1489 = vset.pattern.permute.xlu2 %v1929_v21 }
  0x61   : > { %547 = vperm.xlu1 %1488, %v1524_v20  }
  0x65   : > { %1492 = vset.pattern.permute.xlu0 %v1688_v23 }
  0x68   : > { %553 = vperm.xlu2 %1489, %v1524_v20  }
  0x69   : > { %1491 = vset.pattern.permute.xlu1 %v1688_v23 }
  0x70   : > { %1490 = vset.pattern.permute.xlu2 %v1688_v23 }
  0xab   : > { %v497_v27 = vpop.xlane.xlu2 %496  ;;  %v503_v33 = vpop.xlane.xlu1 %502 }
  0xac   : > { %v491_v30 = vpop.xlane.xlu0 %490  ;;  %v524_v39 = vmul.f32 %v519_v32, %v503_v33  ;;  %v522_v46 = vmul.f32 %v519_v32, %v497_v27 }
  0xad   : > { %v520_v34 = vmul.f32 %v519_v32, %v491_v30 }
  0xb3   : > { %v509_v31 = vpop.xlane.xlu2 %508  ;;  %v506_v38 = vpop.xlane.xlu1 %505 }
  0xb4   : > { %v494_v37 = vpop.xlane.xlu0 %493  ;;  %v526_v47 = vmul.f32 %v519_v32, %v509_v31  ;;  %v525_v51 = vmul.f32 %v519_v32, %v506_v38  ;;  %v1974_v31 = vadd.s32 4294967272, %v1963_v24 }
  0xb5   : > { %v521_v43 = vmul.f32 %v519_v32, %v494_v37 }
  0xbb   : > { %v536_v35 = vpop.permute.xlu2 %535  ;;  %v512_v42 = vpop.xlane.xlu1 %511 }
  0xbc   : > { %v559_v36 = vadd.f32 %v536_v35, %v520_v34  ;;  %v563_v40 = vadd.f32 %v536_v35, %v524_v39  ;;  %v500_v41 = vpop.xlane.xlu0 %499  ;;  %v527_v52 = vmul.f32 %v519_v32, %v512_v42 }
  0xbd   : > { %v523_v57 = vmul.f32 %v519_v32, %v500_v41 }
  0xbe   : > { %628 = vperm.xlu2 %1490, %v559_v36   ;;  %v1508_v6 = vpack.i.bf16 %v559_v36, %v563_v40 }
  0xc3   : > { %v554_v54 = vpop.permute.xlu2 %553 }
  0xc4   : > { %v566_v55 = vadd.f32 %v554_v54, %v527_v52  ;;  %v562_v58 = vadd.f32 %v554_v54, %v523_v57 }
  0xc6   : > { %640 = vperm.xlu2 %1490, %v563_v40   ;;  %v1493_v61 = vpack.i.bf16 %v562_v58, %v566_v55 }
  0xcf   : > { %v542_v44 = vpop.permute.xlu0 %541 }
  0xd0   : > { %v560_v45 = vadd.f32 %v542_v44, %v521_v43  ;;  %v564_v53 = vadd.f32 %v542_v44, %v525_v51  ;;  %v568_v51 = vld [vmem:[%s2212_s2 + $0x8] sm:$0xff] }
  0xd2   : > { %631 = vperm.xlu1 %1491, %v560_v45   ;;  %v1503_v60 = vpack.i.bf16 %v560_v45, %v564_v53  ;;  %v570_v45 = vld [vmem:[%s2212_s2 + $0x18] sm:$0xff] }
  0xd3   : > { %v548_v48 = vpop.permute.xlu1 %547 }
  0xd4   : > { %v561_v49 = vadd.f32 %v548_v48, %v522_v46  ;;  %v565_v50 = vadd.f32 %v548_v48, %v526_v47  ;;  %v569_v47 = vld [vmem:[%s2212_s2 + $0x10] sm:$0xff] }
  0xd5   : > { %v573_v54 = vadd.f32 %v569_v47, %v1889_v5 }
  0xd6   : > { %634 = vperm.xlu0 %1492, %v561_v49   ;;  %646 = vperm.xlu2 %1490, %v565_v50   ;;  %v1498_v56 = vpack.i.bf16 %v561_v49, %v565_v50  ;;  %v578_v49 = vadd.f32 %v570_v45, %v1916_v16  ;;  %v574_v50 = vadd.f32 %v570_v45, %v1919_v17 }
  0xda   : > { %643 = vperm.xlu1 %1491, %v564_v53  }
  0xde   : > { %1499 = vrot.lane.b32.xlu0 %v1498_v56, %s1689_s23  ;;  %649 = vperm.xlu2 %1490, %v566_v55  }
  0xe2   : > { %637 = vperm.xlu1 %1491, %v562_v58   ;;  %v577_v58 = vadd.f32 %v569_v47, %v1904_v11 }
  0xe6   : > { %852 = vperm.xlu0 %1492, %v846_v59   ;;  %1504 = vrot.lane.b32.xlu2 %v1503_v60, %s1689_s23  ;;  %v572_v60 = vadd.f32 %v568_v51, %v1907_v12 }
  0xea   : > { %1494 = vrot.lane.b32.xlu1 %v1493_v61, %s1689_s23 }
  0xee   : > { %867 = vperm.xlu0 %1492, %v849_v62   ;;  %857 = vperm.xlu2 %1490, %v847_v63   ;;  %v567_v62 = vld [vmem:[%s2212_s2] sm:$0xff]  ;;  %v576_v63 = vadd.f32 %v568_v51, %v1901_v10 }
  0xf2   : > { %1509 = vrot.lane.b32.xlu1 %v1508_v6, %s1689_s23  ;;  %v575_v6 = vadd.f32 %v567_v62, %v1886_v4  ;;  %v698_v4 = vld [vmem:[%s2215_s5] sm:$0xff] }
  0xf6   : > { %1515 = vset.pattern.permute.xlu0 %v1881_v3  ;;  %1513 = vset.pattern.permute.xlu2 %v1874_v1 }
  0xfa   : > { %862 = vperm.xlu1 %1491, %v848_v7   ;;  %v571_v7 = vadd.f32 %v567_v62, %v1896_v8  ;;  %v699_v8 = vld [vmem:[%s2215_s5 + $0x8] sm:$0xff] }
 0x102   : > { %1514 = vset.pattern.permute.xlu1 %v1878_v2 }
 0x118   : > { %v629_v18 = vpop.permute.xlu2 %628 }
 0x119   : > { %v653_v36 = vperm.slane %v629_v18, %v1963_v24 }
 0x120   : > { %v641_v19 = vpop.permute.xlu2 %640 }
 0x121   : > { %v666_v29 = vperm.slane %v641_v19, %v1963_v24 }
 0x130   : > { %v647_v22 = vpop.permute.xlu2 %646 }
 0x131   : > { %v669_v33 = vperm.slane %v647_v22, %v1970_v28  ;;  %v701_v22 = vld [vmem:[%s2215_s5 + $0x18] sm:$0xff] }
 0x138   : > { %v650_v34 = vpop.permute.xlu2 %649 }
 0x139   : > { %v671_v39 = vperm.slane %v650_v34, %v1974_v31 }
 0x140   : > { %v1505_v52 = vpop.permute.xlu2 %1504 }
 0x141   : > { %v1507_v61 = vunpack.i.h.bf16 %v1505_v52  ;;  %v1506_v5 = vunpack.i.l.bf16 %v1505_v52 }
 0x143   : > { %v612_v9 = vsel %vm488_vm0, %v572_v60, %v1507_v61  ;;  %v616_v13 = vsel %vm488_vm0, %v576_v63, %v1506_v5 }
 0x144   : > { %v632_v20 = vpop.permute.xlu1 %631 }
 0x145   : > { %v655_v32 = vperm.slane %v632_v20, %v1966_v25  ;;  %v700_v20 = vld [vmem:[%s2215_s5 + $0x10] sm:$0xff] }
 0x147   : > { %v657_v40 = vsel %vm656_vm2, %v655_v32, %v653_v36 }
 0x148   : > { %v635_v30 = vpop.permute.xlu0 %634 }
 0x149   : > { %v659_v35 = vperm.slane %v635_v30, %v1970_v28 }
 0x14b   : > { %v661_v42 = vsel %vm660_vm3, %v659_v35, %v657_v40  ;;  %v858_v35 = vpop.permute.xlu2 %857 }
 0x14c   : > { %v644_v26 = vpop.permute.xlu1 %643 }
 0x14d   : > { %v667_v27 = vperm.slane %v644_v26, %v1966_v25  ;;  %v1525_v26 = vld [vmem:[%s2214_s4] ss:$0 sm:$0xff] }
 0x14f   : > { %v668_v0 = vsel %vm656_vm2, %v667_v27, %v666_v29 }
 0x150   : > { %v670_v38 = vsel %vm660_vm3, %v669_v33, %v668_v0  ;;  %v1500_v48 = vpop.permute.xlu0 %1499 }
 0x151   : > { %v672_v44 = vsel %vm664_vm4, %v671_v39, %v670_v38  ;;  %v1502_v55 = vunpack.i.h.bf16 %v1500_v48  ;;  %v1501_v59 = vunpack.i.l.bf16 %v1500_v48 }
 0x153   : > { %v613_v11 = vsel %vm488_vm0, %v573_v54, %v1502_v55  ;;  %v617_v12 = vsel %vm488_vm0, %v577_v58, %v1501_v59 }
 0x154   : > { %v638_v37 = vpop.permute.xlu1 %637 }
 0x155   : > { %v663_v41 = vperm.slane %v638_v37, %v1974_v31 }
 0x157   : > { %v665_v43 = vsel %vm664_vm4, %v663_v41, %v661_v42 }
 0x158   : > { %v674_v46 = vsel %vm673_vm5, %v672_v44, %v665_v43  ;;  %v853_v34 = vpop.permute.xlu0 %852 }
 0x159   : > { %1398 = vmatmul.msk.f32.vlgmr.msra.gmra.mxu0 %vm675_vm6, %v674_v46 }
 0x15c   : > { %v1495_v53 = vpop.permute.xlu1 %1494 }
 0x15d   : > { %v1497_v56 = vunpack.i.h.bf16 %v1495_v53  ;;  %v1496_v57 = vunpack.i.l.bf16 %v1495_v53 }
 0x15f   : > { %v614_v16 = vsel %vm488_vm0, %v574_v50, %v1497_v56  ;;  %v618_v17 = vsel %vm488_vm0, %v578_v49, %v1496_v57 }
 0x160   : > { %726 = vmatpush.msra.mxu1 %v614_v16  ;;  %771 = vmatpush.msra.mxu2 %v614_v16  ;;  %v868_v38 = vpop.permute.xlu0 %867 }
 0x161   : > { %800 = vmatpush.msra.mxu3 %v618_v17  ;;  %829 = vmatpush.msrb.mxu0 %v618_v17 }
 0x162   : > { %727 = vmatpush.msra.mxu1 %v613_v11  ;;  %772 = vmatpush.msra.mxu2 %v613_v11 }
 0x163   : > { %801 = vmatpush.msra.mxu3 %v617_v12  ;;  %830 = vmatpush.msrb.mxu0 %v617_v12 }
 0x164   : > { %v1510_v10 = vpop.permute.xlu1 %1509  ;;  %728 = vmatpush.msra.mxu1 %v612_v9  ;;  %773 = vmatpush.msra.mxu2 %v612_v9 }
 0x165   : > { %v1512_v14 = vunpack.i.h.bf16 %v1510_v10  ;;  %v1511_v15 = vunpack.i.l.bf16 %v1510_v10  ;;  %802 = vmatpush.msra.mxu3 %v616_v13  ;;  %831 = vmatpush.msrb.mxu0 %v616_v13 }
 0x167   : > { %v611_v18 = vsel %vm488_vm0, %v571_v7, %v1512_v14  ;;  %v615_v19 = vsel %vm488_vm0, %v575_v6, %v1511_v15  ;;  %v743_v7 = vld [vmem:[%s2217_s7] sm:$0xff] }
 0x168   : > { %729 = vmatpush.msra.mxu1 %v611_v18  ;;  %774 = vmatpush.msra.mxu2 %v611_v18 }
 0x169   : > { %803 = vmatpush.msra.mxu3 %v615_v19  ;;  %832 = vmatpush.msrb.mxu0 %v615_v19 }
 0x16a   : > { %1399 = vmatmul.msk.f32.vlgmr.msra.gmra.mxu1 %vm675_vm6, %v698_v4  ;;  %1407 = vmatmul.msk.f32.vlgmr.msra.gmra.mxu3 %vm675_vm6, %v698_v4 }
 0x16b   : > { %1403 = vmatmul.msk.f32.vlgmr.msra.gmra.mxu2 %vm675_vm6, %v743_v7  ;;  %1411 = vmatmul.msk.f32.vlgmr.msrb.gmra.mxu0 %vm675_vm6, %v743_v7  ;;  %v744_v7 = vld [vmem:[%s2217_s7 + $0x8] sm:$0xff] }
 0x16c   : > { %v863_v36 = vpop.permute.xlu1 %862 }
 0x172   : > { %1400 = vmatmul.msk.f32.gmra.mxu1 %vm675_vm6, %v699_v8  ;;  %1408 = vmatmul.msk.f32.gmra.mxu3 %vm675_vm6, %v699_v8 }
 0x173   : > { %1404 = vmatmul.msk.f32.gmra.mxu2 %vm675_vm6, %v744_v7  ;;  %1412 = vmatmul.msk.f32.gmra.mxu0 %vm675_vm6, %v744_v7 }
 0x17a   : > { %1401 = vmatmul.msk.f32.gmra.mxu1 %vm675_vm6, %v700_v20  ;;  %1409 = vmatmul.msk.f32.gmra.mxu3 %vm675_vm6, %v700_v20 }
 0x182   : > { %1402 = vmatmul.msk.f32.gmra.mxu1 %vm675_vm6, %v701_v22  ;;  %1410 = vmatmul.msk.f32.gmra.mxu3 %vm675_vm6, %v701_v22 }
 0x1d6   : > { %v695_v27 = vpop.f32.mrf.mxu0 }
 0x1d7   : > { %v696_v29 = vadd.f32 %v1525_v26, %v695_v27 }
 0x1d9   : > { %v910_v30 = vperm.slane %v696_v29, 0  ;;  %v935_v32 = vperm.slane %v696_v29, 1 }
 0x1db   : > { %927 = vperm.xlu0 %1515, %v910_v30   ;;  %921 = vperm.xlu1 %1514, %v910_v30  }
 0x1dc   : > { %915 = vperm.xlu2 %1513, %v910_v30  }
 0x1e3   : > { %1520 = vset.pattern.permute.xlu0 %v1929_v21  ;;  %1517 = vset.pattern.permute.xlu1 %v1874_v1 }
 0x1e4   : > { %1516 = vset.pattern.permute.xlu2 %v1929_v21 }
 0x1e7   : > { %v731_v0 = vpop.f32.mrf.mxu1 }
 0x1e8   : > { %v870_v43 = vadd.f32 %v853_v34, %v731_v0 }
 0x1eb   : > { %958 = vperm.xlu0 %1520, %v935_v32   ;;  %940 = vperm.xlu1 %1517, %v935_v32  }
 0x1ec   : > { %933 = vperm.xlu2 %1516, %v910_v30  }
 0x1ed   : > { %v805_v33 = vpop.f32.mrf.mxu3 }
 0x1ee   : > { %v874_v55 = vadd.f32 %v853_v34, %v805_v33 }
 0x1ef   : > { %v734_v1 = vpop.f32.mrf.mxu1 }
 0x1f3   : > { %1519 = vset.pattern.permute.xlu1 %v1881_v3  ;;  %1521 = vset.pattern.permute.xlu0 %v1688_v23  ;;  %v871_v3 = vadd.f32 %v858_v35, %v734_v1 }
 0x1f4   : > { %1518 = vset.pattern.permute.xlu2 %v1878_v2 }
 0x1f5   : > { %v808_v37 = vpop.f32.mrf.mxu3 }
 0x1f6   : > { %v875_v59 = vadd.f32 %v858_v35, %v808_v37 }
 0x1f7   : > { %v737_v39 = vpop.f32.mrf.mxu1 }
 0x1f8   : > { %v872_v45 = vadd.f32 %v863_v36, %v737_v39 }
 0x1fb   : > { %952 = vperm.xlu1 %1519, %v935_v32  }
 0x1fc   : > { %946 = vperm.xlu2 %1518, %v935_v32  }
 0x1fd   : > { %v811_v42 = vpop.f32.mrf.mxu3 }
 0x1fe   : > { %v876_v35 = vadd.f32 %v863_v36, %v811_v42 }
 0x204   : > { %1522 = vset.pattern.permute.xlu2 %v1688_v23  ;;  %v740_v23 = vpop.f32.mrf.mxu1 }
 0x205   : > { %v873_v50 = vadd.f32 %v868_v38, %v740_v23  ;;  %v814_v56 = vpop.f32.mrf.mxu3 }
 0x206   : > { %v877_v63 = vadd.f32 %v868_v38, %v814_v56 }
 0x236   : > { %v916_v40 = vpop.permute.xlu2 %915 }
 0x237   : > { %v960_v47 = vmul.f32 %v916_v40, %v870_v43 }
 0x239   : > { %v969_v51 = vsel %vm968_vm7, %v960_v47, 0.0 }
 0x23a   : > { %v970_v57 = vrot.slane %v969_v51, 4 }
 0x23c   : > { %v971_v12 = vadd.f32 %v970_v57, %v969_v51 }
 0x23e   : > { %v972_v19 = vrot.slane %v971_v12, 2 }
 0x240   : > { %v973_v29 = vadd.f32 %v972_v19, %v971_v12 }
 0x242   : > { %v974_v37 = vrot.slane %v973_v29, 1 }
 0x246   : > { %v934_v46 = vpop.permute.xlu2 %933 }
 0x247   : > { %v963_v54 = vmul.f32 %v934_v46, %v873_v50 }
 0x249   : > { %v990_v5 = vsel %vm968_vm7, %v963_v54, 0.0 }
 0x24a   : > { %v991_v14 = vrot.slane %v990_v5, 4 }
 0x24c   : > { %v992_v22 = vadd.f32 %v991_v14, %v990_v5  ;;  %v879_v14 = vld [vmem:[%s2218_s8 + $0x8] sm:$0xff] }
 0x24d   : > { %v922_v41 = vpop.permute.xlu1 %921  ;;  %v928_v2 = vpop.permute.xlu0 %927 }
 0x24e   : > { %v961_v44 = vmul.f32 %v922_v41, %v871_v3  ;;  %v962_v48 = vmul.f32 %v928_v2, %v872_v45  ;;  %v993_v33 = vrot.slane %v992_v22, 2  ;;  %v2062_v45 = vadd.f32 %v974_v37, %v973_v29 }
 0x250   : > { %v976_v49 = vsel %vm968_vm7, %v961_v44, 0.0  ;;  %v983_v53 = vsel %vm968_vm7, %v962_v48, 0.0  ;;  %v994_v3 = vadd.f32 %v993_v33, %v992_v22 }
 0x251   : > { %v977_v52 = vrot.slane %v976_v49, 4  ;;  %v984_v60 = vrot.slane %v983_v53, 4 }
 0x252   : > { %v995_v50 = vrot.slane %v994_v3, 1 }
 0x253   : > { %v978_v16 = vadd.f32 %v977_v52, %v976_v49  ;;  %v985_v9 = vadd.f32 %v984_v60, %v983_v53 }
 0x254   : > { %v996_v56 = vadd.f32 %v995_v50, %v994_v3 }
 0x255   : > { %v979_v15 = vrot.slane %v978_v16, 2  ;;  %v986_v4 = vrot.slane %v985_v9, 2 }
 0x256   : > { %v947_v58 = vpop.permute.xlu2 %946 }
 0x257   : > { %v965_v11 = vmul.f32 %v947_v58, %v875_v59  ;;  %v980_v26 = vadd.f32 %v979_v15, %v978_v16  ;;  %v987_v32 = vadd.f32 %v986_v4, %v985_v9  ;;  %v878_v9 = vld [vmem:[%s2218_s8] sm:$0xff]  ;;  %v881_v15 = vld [vmem:[%s2218_s8 + $0x18] sm:$0xff] }
 0x258   : > { %884 = vperm.xlu0 %1521, %v878_v9  }
 0x259   : > { %v1004_v18 = vsel %vm968_vm7, %v965_v11, 0.0  ;;  %v981_v34 = vrot.slane %v980_v26, 1  ;;  %v988_v39 = vrot.slane %v987_v32, 1 }
 0x25a   : > { %v1005_v27 = vrot.slane %v1004_v18, 4 }
 0x25b   : > { %v2060_v43 = vadd.f32 %v981_v34, %v980_v26  ;;  %v989_v23 = vadd.f32 %v988_v39, %v987_v32 }
 0x25c   : > { %v1006_v1 = vadd.f32 %v1005_v27, %v1004_v18  ;;  %v880_v18 = vld [vmem:[%s2218_s8 + $0x10] sm:$0xff] }
 0x25d   : > { %v941_v61 = vpop.permute.xlu1 %940  ;;  %v959_v62 = vpop.permute.xlu0 %958  ;;  %v1033_v36 = vsel %vm673_vm5, %v2060_v43, %v2062_v45 }
 0x25e   : > { %v964_v17 = vmul.f32 %v941_v61, %v874_v55  ;;  %v967_v13 = vmul.f32 %v959_v62, %v877_v63  ;;  %v1007_v44 = vrot.slane %v1006_v1, 2  ;;  %v1035_v53 = vsel %vm1034_vm8, %v989_v23, %v1033_v36 }
 0x25f   : > { %v1037_v60 = vsel %vm1036_vm9, %v996_v56, %v1035_v53 }
 0x260   : > { %v997_v6 = vsel %vm968_vm7, %v964_v17, 0.0  ;;  %v1018_v20 = vsel %vm968_vm7, %v967_v13, 0.0  ;;  %v1008_v42 = vadd.f32 %v1007_v44, %v1006_v1  ;;  %v746_v13 = vld [vmem:[%s2217_s7 + $0x18] sm:$0xff]  ;;  %889 = vperm.xlu0 %1521, %v879_v14  }
 0x261   : > { %v998_v10 = vrot.slane %v997_v6, 4  ;;  %v1019_v30 = vrot.slane %v1018_v20, 4 }
 0x262   : > { %v1009_v57 = vrot.slane %v1008_v42, 1 }
 0x263   : > { %v999_v8 = vadd.f32 %v998_v10, %v997_v6  ;;  %v1020_v38 = vadd.f32 %v1019_v30, %v1018_v20  ;;  %v745_v10 = vld [vmem:[%s2217_s7 + $0x10] sm:$0xff] }
 0x264   : > { %v1010_v17 = vadd.f32 %v1009_v57, %v1008_v42  ;;  %1405 = vmatmul.msk.f32.gmra.mxu2 %vm675_vm6, %v745_v10  ;;  %1413 = vmatmul.msk.f32.gmra.mxu0 %vm675_vm6, %v745_v10 }
 0x265   : > { %v1000_v0 = vrot.slane %v999_v8, 2  ;;  %v1021_v46 = vrot.slane %v1020_v38, 2 }
 0x267   : > { %v1001_v40 = vadd.f32 %v1000_v0, %v999_v8  ;;  %v1022_v52 = vadd.f32 %v1021_v46, %v1020_v38 }
 0x268   : > { %894 = vperm.xlu0 %1521, %v880_v18  }
 0x269   : > { %v1002_v48 = vrot.slane %v1001_v40, 1  ;;  %v1023_v59 = vrot.slane %v1022_v52, 1 }
 0x26b   : > { %v1003_v54 = vadd.f32 %v1002_v48, %v1001_v40  ;;  %v1024_v63 = vadd.f32 %v1023_v59, %v1022_v52 }
 0x26c   : > { %1406 = vmatmul.msk.f32.gmra.mxu2 %vm675_vm6, %v746_v13  ;;  %1414 = vmatmul.msk.f32.gmra.mxu0 %vm675_vm6, %v746_v13 }
 0x26d   : > { %v953_v41 = vpop.permute.xlu1 %952  ;;  %v1039_v16 = vsel %vm1038_vm10, %v1003_v54, %v1037_v60 }
 0x26e   : > { %v966_v2 = vmul.f32 %v953_v41, %v876_v35  ;;  %v1041_v5 = vsel %vm1040_vm11, %v1010_v17, %v1039_v16 }
 0x270   : > { %v1011_v47 = vsel %vm968_vm7, %v966_v2, 0.0  ;;  %1523 = vset.pattern.permute.xlu0 %v1929_v21 }
 0x271   : > { %v1012_v49 = vrot.slane %v1011_v47, 4 }
 0x273   : > { %v1013_v51 = vadd.f32 %v1012_v49, %v1011_v47 }
 0x275   : > { %v1014_v55 = vrot.slane %v1013_v51, 2 }
 0x277   : > { %v1015_v58 = vadd.f32 %v1014_v55, %v1013_v51 }
 0x279   : > { %v1016_v61 = vrot.slane %v1015_v58, 1 }
 0x27b   : > { %v1017_v62 = vadd.f32 %v1016_v61, %v1015_v58 }
 0x27d   : > { %v1043_v11 = vsel %vm1042_vm12, %v1017_v62, %v1041_v5 }
 0x27e   : > { %v1045_v12 = vsel %vm1044_vm13, %v1024_v63, %v1043_v11 }
 0x27f   : > { %v1047_v6 = vsel %vm968_vm7, %v1045_v12, -inf }
 0x280   : > { %1048 = vmax.xlane.f32.xlu2 %v1047_v6 }
 0x298   : > { %899 = vperm.xlu2 %1522, %v881_v15  }
 0x2f3   : > { %v1049_v19 = vpop.xlane.xlu2 %1048 }
 0x2f4   : > { %v1051_v4 = vrot.slane %v1049_v19, 1  ;;  %v1052_v8 = vrot.slane %v1049_v19, 2  ;;  %v1053_v20 = vrot.slane %v1049_v19, 3  ;;  %v1054_v22 = vrot.slane %v1049_v19, 4 }
 0x2f5   : > { %v1055_v26 = vrot.slane %v1049_v19, 5  ;;  %v1066_v27 = vsub.f32 %v2062_v45, %v1049_v19  ;;  %v1056_v29 = vrot.slane %v1049_v19, 6  ;;  %v1057_v30 = vrot.slane %v1049_v19, 7 }
 0x2f6   : > { %v1067_v32 = vsub.f32 %v2060_v43, %v1051_v4  ;;  %v1068_v0 = vsub.f32 %v989_v23, %v1052_v8  ;;  %v1069_v33 = vsub.f32 %v996_v56, %v1053_v20  ;;  %v1070_v34 = vsub.f32 %v1003_v54, %v1054_v22  ;;  %v834_v20 = vpop.f32.mrf.mxu0 }
 0x2f7   : > { %v1074_v1 = vmul.f32 1.442695, %v1066_v27  ;;  %v1071_v35 = vsub.f32 %v1010_v17, %v1055_v26  ;;  %v1072_v37 = vsub.f32 %v1017_v62, %v1056_v29  ;;  %v1073_v41 = vsub.f32 %v1024_v63, %v1057_v30  ;;  %v885_v62 = vpop.permute.xlu0 %884  ;;  %v776_v63 = vpop.f32.mrf.mxu2 }
 0x2f8   : > { %v1076_v38 = vmul.f32 1.442695, %v1067_v32  ;;  %v1078_v39 = vmul.f32 1.442695, %v1068_v0  ;;  %v1080_v40 = vmul.f32 1.442695, %v1069_v33  ;;  %v902_v7 = vadd.f32 %v885_v62, %v776_v63 }
 0x2f9   : > { %1530 = vpow2.f32 %v1074_v1  ;;  %v1082_v3 = vmul.f32 1.442695, %v1070_v34  ;;  %v1084_v44 = vmul.f32 1.442695, %v1071_v35  ;;  %v1086_v2 = vmul.f32 1.442695, %v1072_v37 }
 0x2fa   : > { %1532 = vpow2.f32 %v1076_v38  ;;  %v1088_v45 = vmul.f32 1.442695, %v1073_v41  ;;  %v906_v37 = vadd.f32 %v885_v62, %v834_v20  ;;  %v1234_v20 = vld [vmem:[%s2221_s11] sm:$0xff] }
 0x2fb   : > { %1534 = vpow2.f32 %v1078_v39 }
 0x2fc   : > { %1536 = vpow2.f32 %v1080_v40 }
 0x2fd   : > { %1538 = vpow2.f32 %v1082_v3 }
 0x2fe   : > { %1540 = vpow2.f32 %v1084_v44  ;;  %v837_v3 = vpop.f32.mrf.mxu0 }
 0x2ff   : > { %v1531_v43 = vpop.eup %1530  ;;  %1542 = vpow2.f32 %v1086_v2  ;;  %v890_v5 = vpop.permute.xlu0 %889 }
 0x300   : > { %v1533_v46 = vpop.eup %1532  ;;  %1544 = vpow2.f32 %v1088_v45  ;;  %v779_v12 = vpop.f32.mrf.mxu2 }
 0x301   : > { %v1535_v47 = vpop.eup %1534  ;;  %v1098_v23 = vrot.slane %v1533_v46, 7  ;;  %v903_v22 = vadd.f32 %v890_v5, %v779_v12  ;;  %v1182_v12 = vld [vmem:[#allocation5 + $0x8] sm:$0xff] }
 0x302   : > { %v2105_v48 = vpop.eup %1536  ;;  %v1100_v49 = vrot.slane %v1535_v47, 6 }
 0x303   : > { %v1539_v50 = vpop.eup %1538  ;;  %v1099_v36 = vsel %vm673_vm5, %v1098_v23, %v1531_v43  ;;  %v1102_v42 = vrot.slane %v2105_v48, 5 }
 0x304   : > { %v1541_v51 = vpop.eup %1540  ;;  %v1101_v52 = vsel %vm1034_vm8, %v1100_v49, %v1099_v36  ;;  %v1104_v21 = vrot.slane %v1539_v50, 4 }
 0x305   : > { %v1543_v53 = vpop.eup %1542  ;;  %v1103_v54 = vsel %vm1036_vm9, %v1102_v42, %v1101_v52  ;;  %v1106_v55 = vrot.slane %v1541_v51, 3 }
 0x306   : > { %v2111_v56 = vpop.eup %1544  ;;  %v1105_v57 = vsel %vm1038_vm10, %v1104_v21, %v1103_v54  ;;  %v1108_v58 = vrot.slane %v1543_v53, 2  ;;  %v840_v36 = vpop.f32.mrf.mxu0 }
 0x307   : > { %v1107_v59 = vsel %vm1040_vm11, %v1106_v55, %v1105_v57  ;;  %v1110_v60 = vrot.slane %v2111_v56, 1  ;;  %v895_v15 = vpop.permute.xlu0 %894  ;;  %v900_v54 = vpop.permute.xlu2 %899 }
 0x308   : > { %v1109_v61 = vsel %vm1042_vm12, %v1108_v58, %v1107_v59  ;;  %v782_v26 = vpop.f32.mrf.mxu2  ;;  %v908_v42 = vadd.f32 %v895_v15, %v840_v36 }
 0x309   : > { %v1111_v16 = vsel %vm1044_vm13, %v1110_v60, %v1109_v61  ;;  %v904_v27 = vadd.f32 %v895_v15, %v782_v26  ;;  %v1238_v15 = vld [vmem:[%s2221_s11 + $0x20] sm:$0xff] }
 0x30a   : > { %v1113_v17 = vsel %vm968_vm7, %v1111_v16, 0.0 }
 0x30b   : > { %1114 = vadd.xlane.f32.xlu1 %v1113_v17 }
 0x30e   : > { %v843_v61 = vpop.f32.mrf.mxu0 }
 0x30f   : > { %v909_v16 = vadd.f32 %v900_v54, %v843_v61 }
 0x37e   : > { %v1115_v11 = vpop.xlane.xlu1 %1114 }
 0x37f   : > { %1546 = vrcp.f32 %v1115_v11  ;;  %v1183_v11 = vld [vmem:[#allocation5 + $0x10] sm:$0xff] }
 0x385   : > { %v1547_v6 = vpop.eup %1546 }
 0x386   : > { %v1133_v9 = vmul.f32 %v1547_v6, %v1531_v43  ;;  %v1119_v10 = vrot.slane %v1547_v6, 2  ;;  %v1118_v13 = vrot.slane %v1547_v6, 1  ;;  %v1121_v14 = vrot.slane %v1547_v6, 4 }
 0x387   : > { %v1122_v0 = vrot.slane %v1547_v6, 5  ;;  %v1123_v45 = vrot.slane %v1547_v6, 6  ;;  %v907_v43 = vadd.f32 %v890_v5, %v837_v3  ;;  %v1124_v59 = vrot.slane %v1547_v6, 7  ;;  %v1184_v5 = vld [vmem:[#allocation5 + $0x18] sm:$0xff] }
 0x388   : > { %v1141_v18 = vperm.slane %v1133_v9, 0  ;;  %v1135_v19 = vmul.f32 %v1535_v47, %v1119_v10  ;;  %v1134_v4 = vmul.f32 %v1533_v46, %v1118_v13  ;;  %v1137_v8 = vmul.f32 %v1539_v50, %v1121_v14  ;;  %1226 = vmatpush.msrb.mxu1 %v1184_v5  ;;  %v1241_v9 = vld [vmem:[%s2221_s11 + $0x38] sm:$0xff]  ;;  %v1240_v10 = vld [vmem:[%s2221_s11 + $0x30] sm:$0xff]  ;;  %v1239_v13 = vld [vmem:[%s2221_s11 + $0x28] sm:$0xff] }
 0x389   : > { %v1138_v41 = vmul.f32 %v1541_v51, %v1122_v0  ;;  %v1139_v47 = vmul.f32 %v1543_v53, %v1123_v45  ;;  %v1120_v50 = vrot.slane %v1547_v6, 3  ;;  %v785_v51 = vpop.f32.mrf.mxu2  ;;  %v1140_v53 = vmul.f32 %v2111_v56, %v1124_v59  ;;  %1257 = vmatpush.msrb.mxu2 %v1241_v9 }
 0x38a   : > { %v1149_v29 = vmul.f32 %v1141_v18, %v902_v7  ;;  %v1143_v30 = vperm.slane %v1135_v19, 0  ;;  %v1142_v32 = vperm.slane %v1134_v4, 0  ;;  %v1145_v35 = vperm.slane %v1137_v8, 0  ;;  %1227 = vmatpush.msrb.mxu1 %v1183_v11  ;;  %v1181_v7 = vld [vmem:[#allocation5] sm:$0xff]  ;;  %v1237_v18 = vld [vmem:[%s2221_s11 + $0x18] sm:$0xff]  ;;  %v1236_v19 = vld [vmem:[%s2221_s11 + $0x10] sm:$0xff] }
 0x38b   : > { %v1146_v2 = vperm.slane %v1138_v41, 0  ;;  %v1147_v49 = vperm.slane %v1139_v47, 0  ;;  %v1136_v21 = vmul.f32 %v2105_v48, %v1120_v50  ;;  %v905_v55 = vadd.f32 %v900_v54, %v785_v51  ;;  %1258 = vmatpush.msrb.mxu2 %v1240_v10  ;;  %v1235_v4 = vld [vmem:[%s2221_s11 + $0x8] sm:$0xff] }
 0x38c   : > { %v1157_v33 = vsel %vm968_vm7, %v1149_v29, 0.0  ;;  %v1151_v34 = vmul.f32 %v1143_v30, %v904_v27  ;;  %v1150_v1 = vmul.f32 %v1142_v32, %v903_v22  ;;  %v1153_v40 = vmul.f32 %v1145_v35, %v906_v37  ;;  %1228 = vmatpush.msrb.mxu1 %v1182_v12 }
 0x38d   : > { %1158 = vadd.xlane.f32.xlu1 %v1157_v33  ;;  %v1154_v46 = vmul.f32 %v1146_v2, %v907_v43  ;;  %v1155_v52 = vmul.f32 %v1147_v49, %v908_v42  ;;  %v1144_v58 = vperm.slane %v1136_v21, 0  ;;  %v1148_v62 = vperm.slane %v1140_v53, 0  ;;  %1259 = vmatpush.msrb.mxu2 %v1239_v13  ;;  %v1527_v2 = vld [vmem:[%s2245_s24] ss:$0 sm:$0xff]  ;;  %s1632_s24 = scalar_lea.hbm %s2246_s18, 4 }
 0x38e   : > { %v1163_v38 = vsel %vm968_vm7, %v1151_v34, 0.0  ;;  %v1160_v39 = vsel %vm968_vm7, %v1150_v1, 0.0  ;;  %v1169_v44 = vsel %vm968_vm7, %v1153_v40, 0.0  ;;  %1229 = vmatpush.msrb.mxu1 %v1181_v7  ;;  %p1634_p9 = scmp.lt.s32.totalorder %s1632_s24, %s1628_s14 }
 0x38f   : > { %1164 = vadd.xlane.f32.xlu2 %v1163_v38  ;;  %1161 = vadd.xlane.f32.xlu0 %v1160_v39  ;;  %v1172_v23 = vsel %vm968_vm7, %v1154_v46, 0.0  ;;  %v1175_v57 = vsel %vm968_vm7, %v1155_v52, 0.0  ;;  %v1152_v60 = vmul.f32 %v1144_v58, %v905_v55  ;;  %v1156_v63 = vmul.f32 %v1148_v62, %v909_v16 }
 0x390   : > { %1260 = vmatpush.msrb.mxu2 %v1238_v15  ;;  %p1635_p2 = por %p1634_p9, %p1633_p11 }
 0x391   : > { %v1166_v17 = vsel %vm968_vm7, %v1152_v60, 0.0  ;;  %v1178_v48 = vsel %vm968_vm7, %v1156_v63, 0.0 }
 0x392   : > { %1261 = vmatpush.msrb.mxu2 %v1237_v18  ;;  %p1636_p10 = pnand %p1635_p2, %p1631_p8 }
 0x394   : > { %1262 = vmatpush.msrb.mxu2 %v1236_v19 }
 0x395   : > { %1170 = vadd.xlane.f32.xlu1 %v1169_v44 }
 0x396   : > { %1263 = vmatpush.msrb.mxu2 %v1235_v4 }
 0x398   : > { %1264 = vmatpush.msrb.mxu2 %v1234_v20 }
 0x39d   : > { %1173 = vadd.xlane.f32.xlu1 %v1172_v23 }
 0x3a5   : > { %1176 = vadd.xlane.f32.xlu1 %v1175_v57 }
 0x3ad   : > { %1167 = vadd.xlane.f32.xlu1 %v1166_v17 }
 0x3b5   : > { %1179 = vadd.xlane.f32.xlu1 %v1178_v48 }
 0x400   : > { %v1159_v6 = vpop.xlane.xlu1 %1158 }
 0x401   : > { %v1197_v30 = vperm.slane %v1159_v6, %v1963_v24 }
 0x402   : > { %v1162_v22 = vpop.xlane.xlu0 %1161  ;;  %v1165_v29 = vpop.xlane.xlu2 %1164 }
 0x403   : > { %v1198_v27 = vperm.slane %v1162_v22, %v1966_v25  ;;  %v1200_v0 = vperm.slane %v1165_v29, %v1970_v28 }
 0x405   : > { %v1199_v34 = vsel %vm656_vm2, %v1198_v27, %v1197_v30 }
 0x406   : > { %v1201_v40 = vsel %vm660_vm3, %v1200_v0, %v1199_v34 }
 0x408   : > { %v1171_v56 = vpop.xlane.xlu1 %1170 }
 0x409   : > { %v1204_v1 = vperm.slane %v1171_v56, %v1963_v24  ;;  %v1526_v24 = vld [vmem:[%s2220_s10] ss:$0 sm:$0xff] }
 0x410   : > { %v1174_v14 = vpop.xlane.xlu1 %1173 }
 0x411   : > { %v1205_v32 = vperm.slane %v1174_v14, %v1966_v25 }
 0x413   : > { %v1206_v38 = vsel %vm656_vm2, %v1205_v32, %v1204_v1 }
 0x418   : > { %v1177_v8 = vpop.xlane.xlu1 %1176 }
 0x419   : > { %v1207_v33 = vperm.slane %v1177_v8, %v1970_v28 }
 0x41b   : > { %v1208_v41 = vsel %vm660_vm3, %v1207_v33, %v1206_v38 }
 0x420   : > { %v1168_v26 = vpop.xlane.xlu1 %1167 }
 0x421   : > { %v1202_v35 = vperm.slane %v1168_v26, %v1974_v31 }
 0x423   : > { %v1203_v25 = vsel %vm664_vm4, %v1202_v35, %v1201_v40 }
 0x428   : > { %v1180_v37 = vpop.xlane.xlu1 %1179 }
 0x429   : > { %v1209_v39 = vperm.slane %v1180_v37, %v1974_v31 }
 0x42b   : > { %v1210_v3 = vsel %vm664_vm4, %v1209_v39, %v1208_v41 }
 0x42c   : > { %v1211_v28 = vsel %vm673_vm5, %v1210_v3, %v1203_v25 }
 0x42d   : > { %1415 = vmatmul.msk.f32.vlgmr.msrb.gmra.mxu1 %vm675_vm6, %v1211_v28 }
 0x4aa   : > { %v1231_v44 = vpop.f32.mrf.mxu1 }
 0x4ab   : > { %v1232_v31 = vadd.f32 %v1526_v24, %v1231_v44 }
 0x4ad   : > { %1416 = vmatmul.msk.f32.vlgmr.msrb.gmra.mxu2 %vm488_vm0, %v1232_v31 }
 0x530   : > { %v1266_v45 = vpop.f32.mrf.mxu2 }
 0x531   : > { %v1267_v43 = vadd.f32 %v1527_v2, %v1266_v45 }
 0x533   : > { %v1417_v46 = vmul.f32 -1.442695, %v1267_v43 }
 0x535   : > { %1548 = vpow2.f32 %v1417_v46 }
 0x53b   : > { %v1549_v47 = vpop.eup %1548 }
 0x53c   : > { %v1272_v23 = vadd.f32 1.0, %v1549_v47 }
 0x53e   : > { %1550 = vrcp.f32 %v1272_v23  ;;  %v1284_v42 = vand.u32 2147483648, %v1272_v23  ;;  %v1282_v21 = vand.u32 2147483647, %v1272_v23  ;;  %vm1278_vm15 = vweird.f32 %v1272_v23 }
 0x540   : > { %v1285_v54 = vor.u32 1.1754944e-38, %v1284_v42  ;;  %vm1283_vm2 = vcmp.eq.f32.partialorder %v1282_v21, 8.507059e+37 }
 0x544   : > { %v1551_v49 = vpop.eup %1550 }
 0x545   : > { %v1274_v50 = vmul.f32 %v1551_v49, %v1272_v23  ;;  %vm1279_vm14 = vweird.f32 %v1551_v49 }
 0x546   : > { %vm1280_vm0 = vmor %vm1278_vm15, %vm1279_vm14 }
 0x547   : > { %v1275_v36 = vsub.f32 1.0, %v1274_v50 }
 0x549   : > { %v1276_v52 = vmul.f32 %v1551_v49, %v1275_v36 }
 0x54b   : > { %v1277_v51 = vadd.f32 %v1551_v49, %v1276_v52 }
 0x54d   : > { %v1281_v55 = vsel %vm1280_vm0, %v1551_v49, %v1277_v51 }
 0x54e   : > { %v1286_v57 = vsel %vm1283_vm2, %v1285_v54, %v1281_v55 }
 0x54f   : > { %1289 = vst.msk [vmem:[%s478_s30] sm:$0x3] %vm1288_vm1, %v1286_v57 }
 0x550   : > { %1639 = shalt.err (!%p1636_p10)
}
 0x551   : > { %1430 = dma.vmem_to_hbm [thread:$0]  (%p1829_p3), %s1304_s17, 32, %s1306_s27, %s1291_s29  }
 0x552 PF: > { %s2247_s12 = sld [smem:[#allocation11_spill]]  ;;  %p2249_p12 = scmp.ge.s32.totalorder %s1682_s28, 2 }
 0x554   : > { %p1441_p13 = pnand %p2249_p12, %p1795_p6 }
 0x556   : > { %p1442_p0 = pneg %p1441_p13 }
 0x558   : > { %s1317_s15 = sand.u32 1, %s2247_s12  }
 0x559   : > { %s1318_s9 = scalar_lea.sflag [#allocation4], %s1317_s15 }
 0x55a   : > { %1665 = dma.done.wait (%p1442_p0), %s1318_s9, 32  }
 0x55b   : > { %1667 = vsyncadd (%p1442_p0), %s1318_s9, 4294967264  ;;  %s2250_s30 = sld [smem:[#allocation12_spill]]  ;;  %p27_p5 = scmp.ge.s32.totalorder %s1813_s22, 4  }
 0x55c   : > { %s2251_s27 = sld [smem:[#allocation14_spill]]  ;;  %s2252_s25 = smov %s1674_s26 }
 0x55d   : > { %s2254_s28 = smov %s1813_s22  ;;  %29 = sbr.rel (!%p27_p5) target bundleno = 10 (0xa), region = 121 }
 0x561   : > { %s2253_s26 = smov %s2250_s30 }
 0x562   :  { %1324 = vsyncpa [#allocation3], 1 }
 0x563   :  { %1326 = vsyncpa [#allocation3 + $0x1], 1 }
 0x564   :  { %1327 = vsyncpa [#allocation6], 1 }
 0x565   :  { %1328 = vsyncpa [#allocation4], 1 }
 0x566   :  { %1330 = vsyncpa [#allocation4 + $0x1], 1 }

</bundles_post_ra>
